<compile_context>
chip_gen: v6e
topology: v6e:2x2x1
jax: 0.10.0
libtpu: 0.0.40
codegen_flags: <defaults>
</compile_context>

<pallas_src>
import math
from functools import partial

import jax
import jax.numpy as jnp
from jax.experimental import pallas as pl
from jax.experimental.pallas import tpu as pltpu


def _round_up(x, m):
    return ((x + m - 1) // m) * m


def _make_kernel(input_size, in_pad, hidden_size, batch):
    """Builds the rollout kernel (static shapes closed over)."""

    def kernel(inp_ref, bn_ref, x0_ref, u0_ref, w_cat_ref, w_out_ref,
               x_out_ref, u_out_ref, y_out_ref,
               x_sc, z_sc):
        t = pl.program_id(0)

        @pl.when(t == 0)
        def _init():
            # Carry state lives in VMEM scratch for the whole rollout.
            x_sc[...] = x0_ref[...]
            # Zero the (lane-padded) input half of the fused-matmul buffer once;
            # lanes [input_size, in_pad) multiply zero weight rows but must not be NaN.
            z_sc[:, :in_pad] = jnp.zeros((batch, in_pad), jnp.float32)
            z_sc[:, in_pad:] = u0_ref[...]

        # Stage this step's input into the fused buffer: z = [inp_pad | u_prev].
        z_sc[:, :input_size] = inp_ref[0]

        # delta = [inp | u] @ [[W_in^T ; 0] ; W_rec^T] + (bias + 0.01 * noise_t)
        delta = jnp.dot(z_sc[...], w_cat_ref[...],
                        preferred_element_type=jnp.float32) + bn_ref[0]

        x_new = 0.9 * x_sc[...] + 0.1 * delta
        u_new = jnp.tanh(x_new)
        y = jnp.dot(u_new, w_out_ref[...], preferred_element_type=jnp.float32)

        # Carry state to the next grid step.
        x_sc[...] = x_new
        z_sc[:, in_pad:] = u_new

        x_out_ref[0] = x_new
        u_out_ref[0] = u_new
        y_out_ref[0] = y

    return kernel


def prepare_weights(weight_in, weight_rec, weight_out):
    """One-time weight prep (outside the hot path): transpose, fuse, lane-pad.

    weight_in:  [H, In]   (torch layout)
    weight_rec: [H, H]
    weight_out: [Out, H]
    Returns:
      w_cat_t:     [In_pad + H, H]  rows 0..In-1 = W_in^T, rows In..In_pad-1 = 0,
                                    rows In_pad.. = W_rec^T
      w_out_pad_t: [H, Out_pad]     columns Out..Out_pad-1 = 0 (lane-dense y store)
    """
    hidden_size, input_size = weight_in.shape
    output_size = weight_out.shape[0]
    in_pad = _round_up(input_size, 128)
    out_pad = _round_up(output_size, 128)

    w_cat_t = jnp.zeros((in_pad + hidden_size, hidden_size), jnp.float32)
    w_cat_t = w_cat_t.at[:input_size, :].set(weight_in.T.astype(jnp.float32))
    w_cat_t = w_cat_t.at[in_pad:, :].set(weight_rec.T.astype(jnp.float32))

    w_out_pad_t = jnp.zeros((hidden_size, out_pad), jnp.float32)
    w_out_pad_t = w_out_pad_t.at[:, :output_size].set(weight_out.T.astype(jnp.float32))
    return w_cat_t, w_out_pad_t


@partial(jax.jit, static_argnames=("output_size",))
def rnn_grid_cell_rollout(inp_seq, x0, u0, w_cat_t, w_out_pad_t, bias, noise_seq,
                          *, output_size):
    """Run T RNNGridCell steps in a single pallas_call.

    inp_seq:   [T, B, In]
    x0, u0:    [B, H]
    w_cat_t:   [In_pad + H, H]   (from prepare_weights)
    w_out_pad_t: [H, Out_pad]
    bias:      [H]
    noise_seq: [T, H]  standard-normal samples (one vector per step)
    Returns (x_seq [T,B,H], u_seq [T,B,H], y_seq [T,B,Out]).
    """
    t_steps, batch, input_size = inp_seq.shape
    hidden_size = x0.shape[1]
    in_pad = w_cat_t.shape[0] - hidden_size
    out_pad = w_out_pad_t.shape[1]

    # Fold bias + 0.01*noise once per rollout: [T, 1, H].
    bn_seq = (bias[None, None, :] + 0.01 * noise_seq[:, None, :]).astype(jnp.float32)

    kernel = _make_kernel(input_size, in_pad, hidden_size, batch)

    grid_spec = pltpu.PrefetchScalarGridSpec(
        num_scalar_prefetch=0,
        grid=(t_steps,),
        in_specs=[
            # per-step blocks
            pl.BlockSpec((1, batch, input_size), lambda t: (t, 0, 0)),   # inp_seq
            pl.BlockSpec((1, 1, hidden_size), lambda t: (t, 0, 0)),      # bias+noise
            # resident blocks (same block index every step -> DMA'd once)
            pl.BlockSpec((batch, hidden_size), lambda t: (0, 0)),        # x0
            pl.BlockSpec((batch, hidden_size), lambda t: (0, 0)),        # u0
            pl.BlockSpec((in_pad + hidden_size, hidden_size), lambda t: (0, 0)),  # fused W
            pl.BlockSpec((hidden_size, out_pad), lambda t: (0, 0)),      # W_out^T (padded)
        ],
        out_specs=(
            pl.BlockSpec((1, batch, hidden_size), lambda t: (t, 0, 0)),  # x trajectory
            pl.BlockSpec((1, batch, hidden_size), lambda t: (t, 0, 0)),  # u trajectory
            pl.BlockSpec((1, batch, out_pad), lambda t: (t, 0, 0)),      # y trajectory
        ),
        scratch_shapes=[
            pltpu.VMEM((batch, hidden_size), jnp.float32),               # x carry
            pltpu.VMEM((batch, in_pad + hidden_size), jnp.float32),      # [inp_pad | u] carry
        ],
    )

    out_shapes = (
        jax.ShapeDtypeStruct((t_steps, batch, hidden_size), jnp.float32),
        jax.ShapeDtypeStruct((t_steps, batch, hidden_size), jnp.float32),
        jax.ShapeDtypeStruct((t_steps, batch, out_pad), jnp.float32),
    )

    x_seq, u_seq, y_seq_pad = pl.pallas_call(
        kernel,
        out_shape=out_shapes,
        grid_spec=grid_spec,
        compiler_params=pltpu.CompilerParams(
            dimension_semantics=("arbitrary",)),   # sequential: state carried across steps
    )(inp_seq, bn_seq, x0, u0, w_cat_t, w_out_pad_t)

    if out_pad != output_size:
        y_seq = y_seq_pad[..., :output_size]
    else:
        y_seq = y_seq_pad
    return x_seq, u_seq, y_seq


def rnn_grid_cell(inp, x, u, weight_in, weight_rec, weight_out, bias, noise):
    """Single-step convenience wrapper matching the torch module's forward."""
    w_cat_t, w_out_pad_t = prepare_weights(weight_in, weight_rec, weight_out)
    x_seq, u_seq, y_seq = rnn_grid_cell_rollout(
        inp[None], x, u, w_cat_t, w_out_pad_t, bias, noise[None],
        output_size=weight_out.shape[0])
    return x_seq[0], u_seq[0], y_seq[0]


def init_params(key, input_size, hidden_size, output_size):
    """Deterministic parameter init mirroring RNNGridCell.reset_parameters."""
    k_in, k_rec, k_out, k_bias = jax.random.split(key, 4)

    # weight_in.data.normal_(stdv_in): mean = 1/sqrt(2), std = 1
    stdv_in = 1.0 / math.sqrt(2.0)
    weight_in = stdv_in + jax.random.normal(
        k_in, (hidden_size, input_size), dtype=jnp.float32)

    # nn.init.orthogonal_(weight_rec): QR of a random normal matrix.
    a = jax.random.normal(k_rec, (hidden_size, hidden_size), dtype=jnp.float32)
    q, r = jnp.linalg.qr(a)
    d = jnp.diag(r)
    q = q * jnp.where(d == 0, 1.0, jnp.sign(d))[None, :]
    weight_rec = q

    # weight_out / bias are left uninitialized by the torch module; use a
    # deterministic small normal so the script is reproducible.
    stdv_out = 1.0 / math.sqrt(hidden_size)
    weight_out = stdv_out * jax.random.normal(
        k_out, (output_size, hidden_size), dtype=jnp.float32)
    bias = stdv_out * jax.random.normal(k_bias, (hidden_size,), dtype=jnp.float32)

    return weight_in, weight_rec, weight_out, bias


if __name__ == "__main__":
    key = jax.random.PRNGKey(0)
    k_params, k_inp, k_x, k_noise = jax.random.split(key, 4)

    T = 8
    batch = 8
    input_size = 32
    hidden_size = 128
    output_size = 64

    weight_in, weight_rec, weight_out, bias = init_params(
        k_params, input_size, hidden_size, output_size)

    inp_seq = jax.random.normal(k_inp, (T, batch, input_size), dtype=jnp.float32)
    x0 = jax.random.normal(k_x, (batch, hidden_size), dtype=jnp.float32)
    u0 = jnp.tanh(x0)
    noise_seq = jax.random.normal(k_noise, (T, hidden_size), dtype=jnp.float32)

    # --- Pallas rollout (weights prepared once, outside the hot path) ---
    w_cat_t, w_out_pad_t = prepare_weights(weight_in, weight_rec, weight_out)
    x_seq, u_seq, y_seq = rnn_grid_cell_rollout(
        inp_seq, x0, u0, w_cat_t, w_out_pad_t, bias, noise_seq,
        output_size=output_size)
    jax.block_until_ready((x_seq, u_seq, y_seq))

    # --- Pure-JAX reference rollout (per-step module semantics) ---
    def step(carry, xs):
        x, u = carry
        inp_t, noise_t = xs
        delta = inp_t @ weight_in.T + bias + u @ weight_rec.T + 0.01 * noise_t
        x = 0.9 * x + 0.1 * delta
        u = jnp.tanh(x)
        y = u @ weight_out.T
        return (x, u), (x, u, y)

    _, (x_ref, u_ref, y_ref) = jax.lax.scan(step, (x0, u0), (inp_seq, noise_seq))

    assert jnp.allclose(x_seq, x_ref, atol=1e-4, rtol=1e-4)
    assert jnp.allclose(u_seq, u_ref, atol=1e-4, rtol=1e-4)
    assert jnp.allclose(y_seq, y_ref, atol=1e-4, rtol=1e-4)

    # --- Single-step wrapper check (exactly the module's forward) ---
    x1, u1, y1 = rnn_grid_cell(
        inp_seq[0], x0, u0, weight_in, weight_rec, weight_out, bias, noise_seq[0])
    jax.block_until_ready((x1, u1, y1))
    assert jnp.allclose(x1, x_ref[0], atol=1e-4, rtol=1e-4)
    assert jnp.allclose(u1, u_ref[0], atol=1e-4, rtol=1e-4)
    assert jnp.allclose(y1, y_ref[0], atol=1e-4, rtol=1e-4)

    print("KERNEL_OK")
</pallas_src>

<mosaic_0001>
module attributes {stable_mosaic.version = 11 : i64} {
  func.func @kernel(%arg0: i32, %arg1: memref<1x8x32xf32, #tpu.memory_space<vmem>>, %arg2: memref<1x1x128xf32, #tpu.memory_space<vmem>>, %arg3: memref<8x128xf32, #tpu.memory_space<vmem>>, %arg4: memref<8x128xf32, #tpu.memory_space<vmem>>, %arg5: memref<256x128xf32, #tpu.memory_space<vmem>>, %arg6: memref<128x128xf32, #tpu.memory_space<vmem>>, %arg7: memref<1x8x128xf32, #tpu.memory_space<vmem>>, %arg8: memref<1x8x128xf32, #tpu.memory_space<vmem>>, %arg9: memref<1x8x128xf32, #tpu.memory_space<vmem>>, %arg10: memref<8x128xf32, #tpu.memory_space<vmem>>, %arg11: memref<8x256xf32, #tpu.memory_space<vmem>>) attributes {dimension_semantics = [#tpu.dimension_semantics<arbitrary>], iteration_bounds = array<i64: 8>, scalar_prefetch = 0 : i64, scratch_operands = 2 : i64, tpu.core_type = #tpu.core_type<tc>, window_params = [{transform_indices = @transform_0, window_bounds = array<i64: 1, 8, 32>}, {transform_indices = @transform_1, window_bounds = array<i64: 1, 1, 128>}, {pipeline_mode = #tpu.pipeline_mode<synchronous>, transform_indices = @transform_2, window_bounds = array<i64: 8, 128>}, {pipeline_mode = #tpu.pipeline_mode<synchronous>, transform_indices = @transform_3, window_bounds = array<i64: 8, 128>}, {pipeline_mode = #tpu.pipeline_mode<synchronous>, transform_indices = @transform_4, window_bounds = array<i64: 256, 128>}, {pipeline_mode = #tpu.pipeline_mode<synchronous>, transform_indices = @transform_5, window_bounds = array<i64: 128, 128>}, {transform_indices = @transform_6, window_bounds = array<i64: 1, 8, 128>}, {transform_indices = @transform_7, window_bounds = array<i64: 1, 8, 128>}, {transform_indices = @transform_8, window_bounds = array<i64: 1, 8, 128>}]} {
    %c0_i32 = arith.constant 0 : i32
    %0 = arith.cmpi eq, %arg0, %c0_i32 : i32
    %1 = arith.extui %0 : i1 to i32
    %c0_i32_0 = arith.constant 0 : i32
    %2 = arith.cmpi ne, %1, %c0_i32_0 : i32
    scf.if %2 {
      %c0_31 = arith.constant 0 : index
      %c0_32 = arith.constant 0 : index
      %33 = vector.load %arg3[%c0_31, %c0_32] : memref<8x128xf32, #tpu.memory_space<vmem>>, vector<8x128xf32>
      %c0_33 = arith.constant 0 : index
      %c0_34 = arith.constant 0 : index
      %34 = vector.load %arg10[%c0_33, %c0_34] : memref<8x128xf32, #tpu.memory_space<vmem>>, vector<8x128xf32>
      tpu.vector_store %arg10[%c0_33, %c0_34], %33 {strides = array<i32>} : memref<8x128xf32, #tpu.memory_space<vmem>>, vector<8x128xf32>,
      %cst_35 = arith.constant 0.000000e+00 : f32
      %35 = vector.broadcast %cst_35 : f32 to vector<8x128xf32>
      %c0_36 = arith.constant 0 : index
      %c0_37 = arith.constant 0 : index
      %36 = vector.load %arg11[%c0_36, %c0_37] : memref<8x256xf32, #tpu.memory_space<vmem>>, vector<8x128xf32>
      tpu.vector_store %arg11[%c0_36, %c0_37], %35 {strides = array<i32>} : memref<8x256xf32, #tpu.memory_space<vmem>>, vector<8x128xf32>,
      %c0_38 = arith.constant 0 : index
      %c0_39 = arith.constant 0 : index
      %37 = vector.load %arg4[%c0_38, %c0_39] : memref<8x128xf32, #tpu.memory_space<vmem>>, vector<8x128xf32>
      %c0_40 = arith.constant 0 : index
      %c128_41 = arith.constant 128 : index
      %38 = vector.load %arg11[%c0_40, %c128_41] : memref<8x256xf32, #tpu.memory_space<vmem>>, vector<8x128xf32>
      tpu.vector_store %arg11[%c0_40, %c128_41], %37 {strides = array<i32>} : memref<8x256xf32, #tpu.memory_space<vmem>>, vector<8x128xf32>,
    } else {
    }
    %c0 = arith.constant 0 : index
    %c0_1 = arith.constant 0 : index
    %c0_2 = arith.constant 0 : index
    %3 = vector.load %arg1[%c0, %c0_1, %c0_2] : memref<1x8x32xf32, #tpu.memory_space<vmem>>, vector<1x8x32xf32>
    %4 = vector.shape_cast %3 : vector<1x8x32xf32> to vector<8x32xf32>
    %c0_3 = arith.constant 0 : index
    %c0_4 = arith.constant 0 : index
    %5 = vector.load %arg11[%c0_3, %c0_4] : memref<8x256xf32, #tpu.memory_space<vmem>>, vector<8x32xf32>
    tpu.vector_store %arg11[%c0_3, %c0_4], %4 {strides = array<i32>} : memref<8x256xf32, #tpu.memory_space<vmem>>, vector<8x32xf32>,
    %c0_5 = arith.constant 0 : index
    %c0_6 = arith.constant 0 : index
    %6 = vector.load %arg11[%c0_5, %c0_6] : memref<8x256xf32, #tpu.memory_space<vmem>>, vector<8x256xf32>
    %c0_7 = arith.constant 0 : index
    %c0_8 = arith.constant 0 : index
    %7 = vector.load %arg5[%c0_7, %c0_8] : memref<256x128xf32, #tpu.memory_space<vmem>>, vector<256x128xf32>
    %cst = arith.constant dense<0.000000e+00> : vector<8x128xf32>
    %8 = tpu.matmul %6, %7, %cst {dimension_numbers = #tpu.dot_dimension_numbers<[1], [0], [0], [1], [0, 0, 1, 1], [], []>} : vector<8x256xf32>, vector<256x128xf32>, vector<8x128xf32> -> vector<8x128xf32>
    %c0_9 = arith.constant 0 : index
    %c0_10 = arith.constant 0 : index
    %c0_11 = arith.constant 0 : index
    %9 = vector.load %arg2[%c0_9, %c0_10, %c0_11] : memref<1x1x128xf32, #tpu.memory_space<vmem>>, vector<1x1x128xf32>
    %10 = vector.shape_cast %9 : vector<1x1x128xf32> to vector<1x128xf32>
    %11 = vector.broadcast %10 : vector<1x128xf32> to vector<8x128xf32>
    %12 = arith.addf %8, %11 : vector<8x128xf32>
    %c0_12 = arith.constant 0 : index
    %c0_13 = arith.constant 0 : index
    %13 = vector.load %arg10[%c0_12, %c0_13] : memref<8x128xf32, #tpu.memory_space<vmem>>, vector<8x128xf32>
    %cst_14 = arith.constant 0.899999976 : f32
    %14 = vector.broadcast %cst_14 : f32 to vector<8x128xf32>
    %15 = arith.mulf %14, %13 : vector<8x128xf32>
    %cst_15 = arith.constant 1.000000e-01 : f32
    %16 = vector.broadcast %cst_15 : f32 to vector<8x128xf32>
    %17 = arith.mulf %16, %12 : vector<8x128xf32>
    %18 = arith.addf %15, %17 : vector<8x128xf32>
    %19 = math.tanh %18 : vector<8x128xf32>
    %c0_16 = arith.constant 0 : index
    %c0_17 = arith.constant 0 : index
    %20 = vector.load %arg6[%c0_16, %c0_17] : memref<128x128xf32, #tpu.memory_space<vmem>>, vector<128x128xf32>
    %cst_18 = arith.constant dense<0.000000e+00> : vector<8x128xf32>
    %21 = tpu.matmul %19, %20, %cst_18 {dimension_numbers = #tpu.dot_dimension_numbers<[1], [0], [0], [1], [0, 0, 1, 1], [], []>} : vector<8x128xf32>, vector<128x128xf32>, vector<8x128xf32> -> vector<8x128xf32>
    %c0_19 = arith.constant 0 : index
    %c0_20 = arith.constant 0 : index
    %22 = vector.load %arg10[%c0_19, %c0_20] : memref<8x128xf32, #tpu.memory_space<vmem>>, vector<8x128xf32>
    tpu.vector_store %arg10[%c0_19, %c0_20], %18 {strides = array<i32>} : memref<8x128xf32, #tpu.memory_space<vmem>>, vector<8x128xf32>,
    %c0_21 = arith.constant 0 : index
    %c128 = arith.constant 128 : index
    %23 = vector.load %arg11[%c0_21, %c128] : memref<8x256xf32, #tpu.memory_space<vmem>>, vector<8x128xf32>
    tpu.vector_store %arg11[%c0_21, %c128], %19 {strides = array<i32>} : memref<8x256xf32, #tpu.memory_space<vmem>>, vector<8x128xf32>,
    %c0_22 = arith.constant 0 : index
    %c0_23 = arith.constant 0 : index
    %c0_24 = arith.constant 0 : index
    %24 = vector.load %arg7[%c0_22, %c0_23, %c0_24] : memref<1x8x128xf32, #tpu.memory_space<vmem>>, vector<1x8x128xf32>
    %25 = vector.shape_cast %24 : vector<1x8x128xf32> to vector<8x128xf32>
    %26 = vector.shape_cast %18 : vector<8x128xf32> to vector<1x8x128xf32>
    tpu.vector_store %arg7[%c0_22, %c0_23, %c0_24], %26 {strides = array<i32>} : memref<1x8x128xf32, #tpu.memory_space<vmem>>, vector<1x8x128xf32>,
    %c0_25 = arith.constant 0 : index
    %c0_26 = arith.constant 0 : index
    %c0_27 = arith.constant 0 : index
    %27 = vector.load %arg8[%c0_25, %c0_26, %c0_27] : memref<1x8x128xf32, #tpu.memory_space<vmem>>, vector<1x8x128xf32>
    %28 = vector.shape_cast %27 : vector<1x8x128xf32> to vector<8x128xf32>
    %29 = vector.shape_cast %19 : vector<8x128xf32> to vector<1x8x128xf32>
    tpu.vector_store %arg8[%c0_25, %c0_26, %c0_27], %29 {strides = array<i32>} : memref<1x8x128xf32, #tpu.memory_space<vmem>>, vector<1x8x128xf32>,
    %c0_28 = arith.constant 0 : index
    %c0_29 = arith.constant 0 : index
    %c0_30 = arith.constant 0 : index
    %30 = vector.load %arg9[%c0_28, %c0_29, %c0_30] : memref<1x8x128xf32, #tpu.memory_space<vmem>>, vector<1x8x128xf32>
    %31 = vector.shape_cast %30 : vector<1x8x128xf32> to vector<8x128xf32>
    %32 = vector.shape_cast %21 : vector<8x128xf32> to vector<1x8x128xf32>
    tpu.vector_store %arg9[%c0_28, %c0_29, %c0_30], %32 {strides = array<i32>} : memref<1x8x128xf32, #tpu.memory_space<vmem>>, vector<1x8x128xf32>,
    return
  }
  func.func @transform_0(%arg0: i32) -> (i32, i32, i32) {
    %c0_i32 = arith.constant 0 : i32
    %c0_i32_0 = arith.constant 0 : i32
    %c0_i32_1 = arith.constant 0 : i32
    return %arg0, %c0_i32, %c0_i32_0 : i32, i32, i32
  }
  func.func @transform_1(%arg0: i32) -> (i32, i32, i32) {
    %c0_i32 = arith.constant 0 : i32
    %c0_i32_0 = arith.constant 0 : i32
    %c0_i32_1 = arith.constant 0 : i32
    return %arg0, %c0_i32, %c0_i32_0 : i32, i32, i32
  }
  func.func @transform_2(%arg0: i32) -> (i32, i32) {
    %c0_i32 = arith.constant 0 : i32
    %c0_i32_0 = arith.constant 0 : i32
    %c0_i32_1 = arith.constant 0 : i32
    return %c0_i32, %c0_i32_0 : i32, i32
  }
  func.func @transform_3(%arg0: i32) -> (i32, i32) {
    %c0_i32 = arith.constant 0 : i32
    %c0_i32_0 = arith.constant 0 : i32
    %c0_i32_1 = arith.constant 0 : i32
    return %c0_i32, %c0_i32_0 : i32, i32
  }
  func.func @transform_4(%arg0: i32) -> (i32, i32) {
    %c0_i32 = arith.constant 0 : i32
    %c0_i32_0 = arith.constant 0 : i32
    %c0_i32_1 = arith.constant 0 : i32
    return %c0_i32, %c0_i32_0 : i32, i32
  }
  func.func @transform_5(%arg0: i32) -> (i32, i32) {
    %c0_i32 = arith.constant 0 : i32
    %c0_i32_0 = arith.constant 0 : i32
    %c0_i32_1 = arith.constant 0 : i32
    return %c0_i32, %c0_i32_0 : i32, i32
  }
  func.func @transform_6(%arg0: i32) -> (i32, i32, i32) {
    %c0_i32 = arith.constant 0 : i32
    %c0_i32_0 = arith.constant 0 : i32
    %c0_i32_1 = arith.constant 0 : i32
    return %arg0, %c0_i32, %c0_i32_0 : i32, i32, i32
  }
  func.func @transform_7(%arg0: i32) -> (i32, i32, i32) {
    %c0_i32 = arith.constant 0 : i32
    %c0_i32_0 = arith.constant 0 : i32
    %c0_i32_1 = arith.constant 0 : i32
    return %arg0, %c0_i32, %c0_i32_0 : i32, i32, i32
  }
  func.func @transform_8(%arg0: i32) -> (i32, i32, i32) {
    %c0_i32 = arith.constant 0 : i32
    %c0_i32_0 = arith.constant 0 : i32
    %c0_i32_1 = arith.constant 0 : i32
    return %arg0, %c0_i32, %c0_i32_0 : i32, i32, i32
  }
}

</mosaic_0001>

<bundles_post_ra>
// kernel: rnn_grid_cell_rollout.1
= control target key start
LH: loop header
LB: loop body
LE: loop exit
PB: predicated region body
PF: predicated region fallthrough
CT: control target
= control target key end

     0   :  { %s1551_s0 = inlined_call_operand.hbm [shape: f32[8,8,32], index: 0, kind: input, shape index: {}]   ;;  %s1552_s1 = inlined_call_operand.vmem [shape: f32[8,1,128], index: 1, kind: input, shape index: {}]   ;;  %s1553_s2 = inlined_call_operand.vmem [shape: f32[8,128], index: 2, kind: input, shape index: {}]   ;;  %s1554_s3 = inlined_call_operand.vmem [shape: f32[8,128], index: 3, kind: input, shape index: {}]   ;;  %s1555_s4 = inlined_call_operand.hbm [shape: f32[256,128], index: 4, kind: input, shape index: {}]   ;;  %s1556_s5 = inlined_call_operand.hbm [shape: f32[128,128], index: 5, kind: input, shape index: {}]   ;;  %s1557_s6 = inlined_call_operand.hbm [shape: f32[8,8,128], index: 6, kind: output, shape index: {0}]   ;;  %s1558_s7 = inlined_call_operand.hbm [shape: f32[8,8,128], index: 7, kind: output, shape index: {1}]   ;;  %s1559_s8 = inlined_call_operand.hbm [shape: f32[8,8,128], index: 8, kind: output, shape index: {2}]  }
   0x1   :  { %1565 = sst [smem:[#allocation19_spill]] %s1555_s4 }
   0x2   :  { %1566 = sst [smem:[#allocation20_spill]] %s1556_s5 }
   0x3   :  { %14 = vsyncpa [#allocation5], 0 }
   0x4   :  { %16 = vsyncpa [#allocation5 + $0x1], 0 }
   0x5   :  { %17 = vsyncpa [#allocation8], 0 }
   0x6   :  { %18 = vsyncpa [#allocation6], 0 }
   0x7   :  { %20 = vsyncpa [#allocation6 + $0x1], 0 }
   0x8   :  { %21 = vsyncpa [#allocation12], 0 }
   0x9   :  { %23 = vsyncpa [#allocation12 + $0x1], 0  ;;  %s1267_s27 = smov 0   ;;  %s1269_s28 = smov 0  }
   0xa   :  { %s1271_s29 = smov 0   ;;  %s1273_s30 = smov 0  }
   0xb LB: > { %s1288_s9 = sadd.s32 4294967295, %s1209_s30   ;;  %s1561_s10 = sadd.s32 4294967294, %s1209_s30   ;;  %s1209_s30 = sphi %s1273_s30, %s1591_s30   ;;  %s1205_s29 = sphi %s1271_s29, %s1590_s29   ;;  %s1201_s28 = sphi %s1269_s28, %s1589_s28   ;;  %s1197_s27 = sphi %s1267_s27, %s1588_s27  }
   0xc   : > { %p49_p0 = scmp.ne.s32.totalorder %s1201_s28, %s1197_s27  ;;  %p1560_p1 = scmp.eq.s32.totalorder %s1288_s9, 0 }
   0xd   : > { %p189_p3 = scmp.eq.s32.totalorder %s1561_s10, 7  ;;  %p811_p5 = scmp.ge.s32.totalorder %s1209_s30, 1 }
   0xe   : > { %p1299_p4 = por %p1560_p1, %p49_p0  ;;  %p248_p7 = scmp.lt.s32.totalorder %s1209_s30, 9 }
   0xf   : > { %p1304_p6 = por %p189_p3, %p49_p0  ;;  %s1211_s14 = smov [#allocation7]  }
  0x10   : > { %s1567_s11 = scalar_select %p1299_p4, 1, 0 }
  0x11   : > { %s1568_s12 = scalar_select %p1304_p6, 1, 0 }
  0x12   : > { %p1310_p9 = pnand %p811_p5, %p248_p7  ;;  %s266_s15 = sshll.u32 %s1211_s14, 4  ;;  %s267_s15 = int_to_ptr.vmem [resolvable:$true] %s266_s15 }
  0x13   : > { %s1212_s17 = smov [#allocation9]   ;;  %s1016_s19 = scalar_lea.vmem %s267_s15, 4096 }
  0x14   : > { %s1569_s13 = scalar_select %p1310_p9, 1, 0 }
  0x15   : > { %p937_p10 = pneg %p1310_p9  ;;  %s279_s18 = sshll.u32 %s1212_s17, 4  ;;  %s280_s18 = int_to_ptr.vmem [resolvable:$true] %s279_s18 }
  0x16   : > { %p1017_p13 = scmp.ne.s32.totalorder %s267_s15, %s1016_s19  ;;  %p1024_p5 = scmp.lt.s32.totalorder %s267_s15, %s267_s15 }
  0x17   : > { %p1318_p11 = pnand %p937_p10, %p1560_p1  ;;  %p1025_p7 = scmp.lt.s32.totalorder %s1016_s19, %s1016_s19 }
  0x19   : > { %p1007_p12 = pneg %p1318_p11  ;;  %p1026_p8 = por %p1025_p7, %p1024_p5 }
  0x1b   : > { %p1019_p0 = pnand %p1017_p13, %p1007_p12 }
  0x1d   : > { %p1020_p3 = pneg %p1019_p0 }
  0x1f   : > { %p1027_p10 = pnand %p1026_p8, %p1020_p3 }
  0x21   : > { %1030 = shalt.err (!%p1027_p10)
}
  0x22   : > { %s1213_s20 = smov 128   ;;  %s1214_s21 = smov 8  }
  0x23   : > { %s1571_s4 = sld [smem:[#allocation19_spill]]  ;;  %s1042_s24 = scalar_lea.vmem %s280_s18, 2048 }
  0x24   : > { %p1043_p1 = scmp.ne.s32.totalorder %s280_s18, %s1042_s24  ;;  %p1050_p2 = scmp.lt.s32.totalorder %s280_s18, %s280_s18 }
  0x25   : > { %p1051_p6 = scmp.lt.s32.totalorder %s1042_s24, %s1042_s24 }
  0x26   : > { %p1045_p13 = pnand %p1043_p1, %p1007_p12 }
  0x27   : > { %p1052_p5 = por %p1051_p6, %p1050_p2 }
  0x28   : > { %p1046_p0 = pneg %p1045_p13 }
  0x29   : > { %940 = dma.hbm_to_vmem [thread:$0]  (!%p1318_p11), %s1571_s4, 4096, %s267_s15, [#allocation8], %s1213_s20, %s1213_s20, %s1214_s21  }
  0x2a   : > { %p1053_p8 = pnand %p1052_p5, %p1046_p0 }
  0x2c   : > { %1056 = shalt.err (!%p1053_p8)
}
  0x2d   : > { %s1572_s5 = sld [smem:[#allocation20_spill]]  ;;  %s1341_s14 = sadd.s32 1, %s1209_s30  }
  0x2e   : > { %s36_s15 = sadd.s32 1, %s1205_s29  ;;  %s33_s16 = ssub.s32 %s1209_s30, %s1341_s14 }
  0x2f   : > { %p43_p1 = scmp.ne.s32.totalorder %s1205_s29, %s1201_s28  ;;  %p34_p2 = scmp.eq.s32.totalorder %s33_s16, 0 }
  0x30   : > { %p44_p6 = scmp.eq.s32.totalorder %s1209_s30, 0  ;;  %p1573_p12 = scmp.eq.s32.totalorder %s1288_s9, 7 }
  0x31   : > { %p960_p7 = scmp.lt.s32.totalorder %s1209_s30, 8  ;;  %s293_s22 = sand.u32 1, %s1205_s29  }
  0x32   : > { %p1351_p3 = por %p1573_p12, %p43_p1  ;;  %p45_p10 = por %p44_p6, %p43_p1 }
  0x33   : > { %943 = dma.hbm_to_vmem [thread:$0]  (!%p1318_p11), %s1572_s5, 2048, %s280_s18, [#allocation8], %s1213_s20, %s1213_s20, %s1214_s21  }
  0x34   : > { %s1574_s17 = scalar_select %p1351_p3, 1, 0 }
  0x35   : > { %s1357_s19 = scalar_select %p34_p2, %s1205_s29, %s36_s15  }
  0x36   : > { %s815_s23 = sshll.u32 %s293_s22, 3  ;;  %s816_s18 = sshll.u32 %s1209_s30, 7 }
  0x37   : > { %1575 = sst [smem:[#allocation18_spill]] %s1357_s19  ;;  %s1364_s24 = scalar_lea.hbm %s1551_s0, %s816_s18 }
  0x38   : > { %s297_s25 = scalar_lea.vmem [#allocation4], %s815_s23  ;;  %p1366_p11 = pnand %p960_p7, %p45_p10 }
  0x39   : > { %s304_s26 = sshll.u32 %s297_s25, 4  ;;  %s294_s15 = scalar_lea.sflag [#allocation5], %s293_s22  ;;  %s305_s26 = int_to_ptr.vmem [resolvable:$true] %s304_s26 }
  0x3a   : > { %s1057_s10 = scalar_lea.hbm %s1364_s24, 128  ;;  %p1059_p0 = pneg %p1366_p11 }
  0x3b   : > { %p1058_p13 = scmp.ne.s32.totalorder %s1364_s24, %s1057_s10  ;;  %s1062_s21 = scalar_lea.hbm %s1551_s0, 1024 }
  0x3c   : > { %p1063_p1 = scmp.lt.s32.totalorder %s1364_s24, %s1551_s0  ;;  %p1064_p2 = scmp.lt.s32.totalorder %s1062_s21, %s1057_s10 }
  0x3d   : > { %p1060_p5 = pnand %p1059_p0, %p1058_p13 }
  0x3e   : > { %p1065_p6 = por %p1064_p2, %p1063_p1 }
  0x3f   : > { %p1061_p8 = pneg %p1060_p5 }
  0x41   : > { %p1066_p12 = pnand %p1065_p6, %p1061_p8 }
  0x43   : > { %1069 = shalt.err (!%p1066_p12)
}
  0x44   : > { %s1070_s25 = scalar_lea.vmem %s305_s26, 128  ;;  %s1215_s22 = smov [#allocation4]  }
  0x45   : > { %p1071_p7 = scmp.ne.s32.totalorder %s305_s26, %s1070_s25  ;;  %s1075_s5 = sshll.u32 %s1215_s22, 4  ;;  %s1076_s5 = int_to_ptr.vmem [resolvable:$false] %s1075_s5 }
  0x46   : > { %s1077_s19 = scalar_lea.vmem %s1076_s5, 256  ;;  %p1078_p13 = scmp.lt.s32.totalorder %s305_s26, %s1076_s5 }
  0x47   : > { %p1073_p10 = pnand %p1071_p7, %p1059_p0  ;;  %p1079_p5 = scmp.lt.s32.totalorder %s1077_s19, %s1070_s25 }
  0x49   : > { %p1074_p3 = pneg %p1073_p10  ;;  %p1080_p4 = por %p1079_p5, %p1078_p13 }
  0x4b   : > { %p1081_p9 = pnand %p1080_p4, %p1074_p3 }
  0x4d   : > { %1084 = shalt.err (!%p1081_p9)
}
  0x4e   : > { %947 = dma.hbm_to_vmem [thread:$0]  (!%p1366_p11), %s1364_s24, 128, %s305_s26, %s294_s15  }
  0x4f   : > { %p1577_p8 = scmp.ne.s32.totalorder %s1569_s13, 0 }
  0x50   : > { %s1387_s4 = sand.u32 (!%p1577_p8), 1, %s1201_s28   ;;  %p1578_p4 = scmp.ne.s32.totalorder (!%p1577_p8), %s1567_s11, 0 }
  0x51   : > { %319 = sbr.rel (%p1577_p8) target bundleno = 558 (0x22e), region = 44  ;;  %s1390_s10 = sshll.u32 (!%p1577_p8), %s1387_s4, 3 }
  0x52   : > { %s322_s5 = scalar_lea.sflag (!%p1577_p8), [#allocation5], %s1387_s4  ;;  %s325_s19 = scalar_lea.vmem (!%p1577_p8), [#allocation4], %s1390_s10 }
  0x56   : > { %1180 = dma.done.wait (%p1578_p4), %s322_s5, 128  }
  0x57   : > { %1182 = vsyncadd (%p1578_p4), %s322_s5, 4294967168  ;;  %p1579_p9 = scmp.eq.s32.totalorder %s1288_s9, 0 }
  0x59   : > { %1184 = dma.done.wait (%p1579_p9), [#allocation8], 6144   ;;  %p1580_p3 = pmov %p1579_p9 }
  0x5a   : > { %p379_p11 = scmp.lt.s32.totalorder %s1288_s9, 7  ;;  %s364_s16 = scalar_lea.vmem [#allocation10], %s1390_s10 }
  0x5b   : > { %1186 = vsyncadd (%p1580_p3), [#allocation8], 4294961152  ;;  %s371_s15 = scalar_lea.vmem [#allocation11], %s1390_s10  ;;  %p1581_p0 = scmp.ne.s32.totalorder %s1288_s9, 0 }
  0x5c   : > { %s1404_s13 = scalar_select %p379_p11, %s1288_s9, 7 }
  0x5d   : > { %385 = sbr.rel (%p1581_p0) target bundleno = 101 (0x65), region = 60 }
  0x5e   : > { %s381_s11 = scalar_lea.vmem %s1552_s1, %s1404_s13 }
  0x62   : > { %v386_v0 = vld [vmem:[%s1553_s2] sm:$0xff]  ;;  %v1216_v2 = vmov 0.0  }
  0x63   : > { %v389_v1 = vld [vmem:[%s1554_s3] sm:$0xff]  ;;  %387 = vst [vmem:[#allocation2] sm:$0xff] %v386_v0  ;;  %388 = vst [vmem:[#allocation3] sm:$0xff] %v1216_v2 }
  0x64   : > { %390 = vst [vmem:[#allocation3 + $0x8] sm:$0xff] %v389_v1 }
  0x65 PF: > { %v427_v3 = vld [vmem:[#allocation7 + $0xf8] sm:$0xff]  ;;  %v426_v5 = vld [vmem:[#allocation7 + $0xf0] sm:$0xff]  ;;  %v1217_v7 = vmov 0.0   ;;  %v425_v8 = vld [vmem:[#allocation7 + $0xe8] sm:$0xff]  ;;  %vm392_vm0 = vcmask 261120   ;;  %vm1218_vm1 = vmmov 0  }
  0x66   : > { %v411_v4 = vld [vmem:[#allocation7 + $0x78] sm:$0xff]  ;;  %834 = vmatprep.subr.mxu0 %v427_v3  ;;  %v410_v6 = vld [vmem:[#allocation7 + $0x70] sm:$0xff]  ;;  %886 = vmatprep.subr.mxu1 %v1217_v7  ;;  %v409_v9 = vld [vmem:[#allocation7 + $0x68] sm:$0xff]  ;;  %s1451_s13 = sshll.u32 %s1288_s9, 7  ;;  %s638_s20 = sshll.u32 %s371_s15, 4  ;;  %s639_s20 = int_to_ptr.vmem [resolvable:$true] %s638_s20 }
  0x67   : > { %835 = vmatpush3.msra.mxu0 %v411_v4  ;;  %v424_v10 = vld [vmem:[#allocation7 + $0xe0] sm:$0xff]  ;;  %v423_v12 = vld [vmem:[#allocation7 + $0xd8] sm:$0xff]  ;;  %v422_v14 = vld [vmem:[#allocation7 + $0xd0] sm:$0xff]  ;;  %918 = vmatprep.mubr.msk.f32.mxu1 %vm1218_vm1, %v1217_v7  ;;  %s1465_s25 = scalar_lea.hbm %s1557_s6, %s1451_s13  ;;  %s1085_s5 = scalar_lea.vmem %s639_s20, 128 }
  0x68   : > { %836 = vmatprep.subr.mxu0 %v426_v5  ;;  %v408_v11 = vld [vmem:[#allocation7 + $0x60] sm:$0xff]  ;;  %v407_v13 = vld [vmem:[#allocation7 + $0x58] sm:$0xff]  ;;  %v406_v15 = vld [vmem:[#allocation7 + $0x50] sm:$0xff]  ;;  %p1086_p1 = scmp.ne.s32.totalorder %s639_s20, %s1085_s5  ;;  %p1582_p2 = scmp.ne.s32.totalorder %s1574_s17, 0 }
  0x69   : > { %837 = vmatpush3.msra.mxu0 %v410_v6  ;;  %v421_v16 = vld [vmem:[#allocation7 + $0xc8] sm:$0xff]  ;;  %v391_v19 = vld [vmem:[%s325_s19] sm:$0xff]  ;;  %v420_v22 = vld [vmem:[#allocation7 + $0xc0] sm:$0xff]  ;;  %s606_s19 = sand.u32 1, %s1288_s9   ;;  %s1219_s9 = smov [#allocation11]  }
  0x6a   : > { %838 = vmatprep.subr.mxu0 %v425_v8  ;;  %v405_v17 = vld [vmem:[#allocation7 + $0x48] sm:$0xff]  ;;  %v525_v20 = vld [vmem:[#allocation9 + $0x78] sm:$0xff]  ;;  %v524_v21 = vld [vmem:[#allocation9 + $0x70] sm:$0xff]  ;;  %393 = vst.msk [vmem:[#allocation3] sm:$0xff] %vm392_vm0, %v391_v19  ;;  %s1467_s22 = scalar_lea.sflag [#allocation12], %s606_s19  ;;  %p1087_p6 = pnand %p1086_p1, %p1582_p2 }
  0x6b   : > { %839 = vmatpush3.msra.mxu0 %v409_v9  ;;  %v395_v18 = vld [vmem:[#allocation3 + $0x8] sm:$0xff]  ;;  %887 = vmatpush3.msra.mxu1 %v525_v20  ;;  %v404_v23 = vld [vmem:[#allocation7 + $0x40] sm:$0xff]  ;;  %v419_v25 = vld [vmem:[#allocation7 + $0xb8] sm:$0xff]  ;;  %s1089_s24 = sshll.u32 %s1219_s9, 4  ;;  %s1090_s24 = int_to_ptr.vmem [resolvable:$false] %s1089_s24 }
  0x6c   : > { %840 = vmatprep.subr.mxu0 %v424_v10  ;;  %499 = vmatprep.mubr.f32.mxu0 %v395_v18  ;;  %v523_v24 = vld [vmem:[#allocation9 + $0x68] sm:$0xff]  ;;  %v403_v26 = vld [vmem:[#allocation7 + $0x38] sm:$0xff]  ;;  %v418_v27 = vld [vmem:[#allocation7 + $0xb0] sm:$0xff]  ;;  %p1088_p12 = pneg %p1087_p6  ;;  %s1091_s26 = scalar_lea.vmem %s1090_s24, 256 }
  0x6d   : > { %841 = vmatpush3.msra.mxu0 %v408_v11  ;;  %888 = vmatprep.subr.mxu1 %v1217_v7  ;;  %v402_v28 = vld [vmem:[#allocation7 + $0x30] sm:$0xff]  ;;  %v417_v29 = vld [vmem:[#allocation7 + $0xa8] sm:$0xff]  ;;  %v416_v31 = vld [vmem:[#allocation7 + $0xa0] sm:$0xff]  ;;  %p1092_p7 = scmp.lt.s32.totalorder %s639_s20, %s1090_s24  ;;  %p1093_p10 = scmp.lt.s32.totalorder %s1091_s26, %s1085_s5 }
  0x6e   : > { %842 = vmatprep.subr.mxu0 %v423_v12  ;;  %889 = vmatpush3.msra.mxu1 %v524_v21  ;;  %v401_v30 = vld [vmem:[#allocation7 + $0x28] sm:$0xff]  ;;  %v400_v32 = vld [vmem:[#allocation7 + $0x20] sm:$0xff]  ;;  %v415_v33 = vld [vmem:[#allocation7 + $0x98] sm:$0xff] }
  0x6f   : > { %843 = vmatpush3.msra.mxu0 %v407_v13  ;;  %890 = vmatprep.subr.mxu1 %v1217_v7  ;;  %v399_v34 = vld [vmem:[#allocation7 + $0x18] sm:$0xff]  ;;  %v414_v35 = vld [vmem:[#allocation7 + $0x90] sm:$0xff]  ;;  %v413_v37 = vld [vmem:[#allocation7 + $0x88] sm:$0xff]  ;;  %p1094_p13 = por %p1093_p10, %p1092_p7 }
  0x70   : > { %844 = vmatprep.subr.mxu0 %v422_v14  ;;  %891 = vmatpush3.msra.mxu1 %v523_v24  ;;  %v398_v36 = vld [vmem:[#allocation7 + $0x10] sm:$0xff]  ;;  %v397_v38 = vld [vmem:[#allocation7 + $0x8] sm:$0xff]  ;;  %v412_v39 = vld [vmem:[#allocation7 + $0x80] sm:$0xff] }
  0x71   : > { %845 = vmatpush3.msra.mxu0 %v406_v15  ;;  %892 = vmatprep.subr.mxu1 %v1217_v7  ;;  %v396_v40 = vld [vmem:[#allocation7] sm:$0xff]  ;;  %v521_v43 = vld [vmem:[#allocation9 + $0x58] sm:$0xff]  ;;  %v520_v44 = vld [vmem:[#allocation9 + $0x50] sm:$0xff]  ;;  %p1095_p5 = pnand %p1094_p13, %p1088_p12 }
  0x72   : > { %846 = vmatprep.subr.mxu0 %v421_v16  ;;  %v394_v41 = vld [vmem:[#allocation3] sm:$0xff]  ;;  %v519_v45 = vld [vmem:[#allocation9 + $0x48] sm:$0xff]  ;;  %v517_v47 = vld [vmem:[#allocation9 + $0x38] sm:$0xff] }
  0x73   : > { %847 = vmatpush3.msra.mxu0 %v405_v17  ;;  %v522_v42 = vld [vmem:[#allocation9 + $0x60] sm:$0xff]  ;;  %v516_v48 = vld [vmem:[#allocation9 + $0x30] sm:$0xff]  ;;  %v515_v49 = vld [vmem:[#allocation9 + $0x28] sm:$0xff] }
  0x74   : > { %848 = vmatprep.subr.mxu0 %v420_v22  ;;  %893 = vmatpush3.msra.mxu1 %v522_v42  ;;  %v518_v46 = vld [vmem:[#allocation9 + $0x40] sm:$0xff]  ;;  %v513_v51 = vld [vmem:[#allocation9 + $0x18] sm:$0xff]  ;;  %v512_v52 = vld [vmem:[#allocation9 + $0x10] sm:$0xff] }
  0x75   : > { %849 = vmatpush3.msra.mxu0 %v404_v23  ;;  %894 = vmatprep.subr.mxu1 %v1217_v7  ;;  %v514_v50 = vld [vmem:[#allocation9 + $0x20] sm:$0xff]  ;;  %v511_v53 = vld [vmem:[#allocation9 + $0x8] sm:$0xff]  ;;  %v825_v56 = vld [vmem:[%s381_s11] ss:$0 sm:$0xff]  ;;  %s1457_s11 = scalar_lea.hbm %s1558_s7, %s1451_s13 }
  0x76   : > { %850 = vmatprep.subr.mxu0 %v419_v25  ;;  %895 = vmatpush3.msra.mxu1 %v521_v43  ;;  %v510_v54 = vld [vmem:[#allocation9] sm:$0xff]  ;;  %v505_v58 = vld [vmem:[#allocation2] sm:$0xff] }
  0x77   : > { %851 = vmatpush3.msra.mxu0 %v403_v26  ;;  %896 = vmatprep.subr.mxu1 %v1217_v7  ;;  %v506_v61 = vmul.f32 0.9, %v505_v58 }
  0x78   : > { %852 = vmatprep.subr.mxu0 %v418_v27  ;;  %897 = vmatpush3.msra.mxu1 %v520_v44 }
  0x79   : > { %853 = vmatpush3.msra.mxu0 %v402_v28  ;;  %898 = vmatprep.subr.mxu1 %v1217_v7 }
  0x7a   : > { %854 = vmatprep.subr.mxu0 %v417_v29  ;;  %899 = vmatpush3.msra.mxu1 %v519_v45 }
  0x7b   : > { %855 = vmatpush3.msra.mxu0 %v401_v30  ;;  %900 = vmatprep.subr.mxu1 %v1217_v7 }
  0x7c   : > { %856 = vmatprep.subr.mxu0 %v416_v31  ;;  %901 = vmatpush3.msra.mxu1 %v518_v46 }
  0x7d   : > { %857 = vmatpush3.msra.mxu0 %v400_v32  ;;  %902 = vmatprep.subr.mxu1 %v1217_v7 }
  0x7e   : > { %858 = vmatprep.subr.mxu0 %v415_v33  ;;  %903 = vmatpush3.msra.mxu1 %v517_v47 }
  0x7f   : > { %859 = vmatpush3.msra.mxu0 %v399_v34  ;;  %904 = vmatprep.subr.mxu1 %v1217_v7 }
  0x80   : > { %860 = vmatprep.subr.mxu0 %v414_v35  ;;  %905 = vmatpush3.msra.mxu1 %v516_v48 }
  0x81   : > { %861 = vmatpush3.msra.mxu0 %v398_v36  ;;  %906 = vmatprep.subr.mxu1 %v1217_v7 }
  0x82   : > { %862 = vmatprep.subr.mxu0 %v413_v37  ;;  %907 = vmatpush3.msra.mxu1 %v515_v49 }
  0x83   : > { %863 = vmatpush3.msra.mxu0 %v397_v38  ;;  %908 = vmatprep.subr.mxu1 %v1217_v7 }
  0x84   : > { %864 = vmatprep.subr.mxu0 %v412_v39  ;;  %909 = vmatpush3.msra.mxu1 %v514_v50 }
  0x85   : > { %865 = vmatpush3.msra.mxu0 %v396_v40  ;;  %910 = vmatprep.subr.mxu1 %v1217_v7 }
  0x86   : > { %500 = vmatmul.mubr.f32.vlgmr.msra.gmra.mxu0 %v394_v41  ;;  %911 = vmatpush3.msra.mxu1 %v513_v51 }
  0x87   : > { %912 = vmatprep.subr.mxu1 %v1217_v7 }
  0x88   : > { %913 = vmatpush3.msra.mxu1 %v512_v52 }
  0x89   : > { %914 = vmatprep.subr.mxu1 %v1217_v7 }
  0x8a   : > { %915 = vmatpush3.msra.mxu1 %v511_v53 }
  0x8b   : > { %916 = vmatprep.subr.mxu1 %v1217_v7 }
  0x8c   : > { %917 = vmatpush3.msra.mxu1 %v510_v54 }
 0x146   : > { %v866_v55 = vpop.f32.mrf.mxu0 }
 0x148   : > { %v867_v57 = vpop.f32.mrf.mxu0 }
 0x149   : > { %v868_v59 = vadd.f32 %v867_v57, %v866_v55 }
 0x14b   : > { %v502_v60 = vadd.f32 %v868_v59, %v825_v56 }
 0x14d   : > { %v507_v62 = vmul.f32 0.1, %v502_v60 }
 0x14f   : > { %v508_v63 = vadd.f32 %v507_v62, %v506_v61 }
 0x151   : > { %1003 = vtanh.f32 %v508_v63  ;;  %596 = vst [vmem:[#allocation2] sm:$0xff] %v508_v63  ;;  %598 = vst [vmem:[%s364_s16] sm:$0xff] %v508_v63 }
 0x15e   : > { %v1004_v0 = vpop.eup %1003 }
 0x15f   : > { %597 = vst [vmem:[#allocation3 + $0x8] sm:$0xff] %v1004_v0  ;;  %599 = vst [vmem:[%s371_s15] sm:$0xff] %v1004_v0  ;;  %919 = vmatmul.mubr.f32.vlgmr.msra.gmra.mxu1 %v1004_v0 }
 0x160   : > { %1098 = shalt.err (!%p1095_p5)
}
 0x161   : > { %s1099_s15 = scalar_lea.hbm %s1457_s11, 128  ;;  %s1103_s23 = scalar_lea.hbm %s1558_s7, 1024 }
 0x162   : > { %p1100_p8 = scmp.ne.s32.totalorder %s1457_s11, %s1099_s15  ;;  %p1104_p3 = scmp.lt.s32.totalorder %s1457_s11, %s1558_s7 }
 0x163   : > { %p1105_p11 = scmp.lt.s32.totalorder %s1103_s23, %s1099_s15 }
 0x164   : > { %p1101_p4 = pnand %p1100_p8, %p1582_p2 }
 0x165   : > { %p1106_p0 = por %p1105_p11, %p1104_p3 }
 0x166   : > { %p1102_p9 = pneg %p1101_p4 }
 0x168   : > { %p1107_p1 = pnand %p1106_p0, %p1102_p9 }
 0x16a   : > { %1110 = shalt.err (!%p1107_p1)
}
 0x16b   : > { %932 = dma.vmem_to_hbm [thread:$0]  (%p1582_p2), %s639_s20, 128, %s1457_s11, %s1467_s22  }
 0x16c   : > { %s625_s5 = sshll.u32 %s364_s16, 4  ;;  %s602_s24 = scalar_lea.sflag [#allocation6], %s1387_s4  ;;  %s626_s5 = int_to_ptr.vmem [resolvable:$true] %s625_s5 }
 0x16d   : > { %s1111_s26 = scalar_lea.vmem %s626_s5, 128  ;;  %s1220_s18 = smov [#allocation10]  }
 0x16e   : > { %p1112_p6 = scmp.ne.s32.totalorder %s626_s5, %s1111_s26  ;;  %s1115_s15 = sshll.u32 %s1220_s18, 4  ;;  %s1116_s15 = int_to_ptr.vmem [resolvable:$false] %s1115_s15 }
 0x16f   : > { %s1117_s19 = scalar_lea.vmem %s1116_s15, 256  ;;  %p1118_p10 = scmp.lt.s32.totalorder %s626_s5, %s1116_s15 }
 0x170   : > { %p1113_p12 = pnand %p1112_p6, %p1582_p2  ;;  %p1119_p13 = scmp.lt.s32.totalorder %s1117_s19, %s1111_s26 }
 0x172   : > { %p1114_p7 = pneg %p1113_p12  ;;  %p1120_p5 = por %p1119_p13, %p1118_p10 }
 0x174   : > { %p1121_p8 = pnand %p1120_p5, %p1114_p7 }
 0x176   : > { %1124 = shalt.err (!%p1121_p8)
}
 0x177   : > { %s1125_s16 = scalar_lea.hbm %s1465_s25, 128  ;;  %s1129_s20 = scalar_lea.hbm %s1557_s6, 1024 }
 0x178   : > { %p1126_p4 = scmp.ne.s32.totalorder %s1465_s25, %s1125_s16  ;;  %p1130_p11 = scmp.lt.s32.totalorder %s1465_s25, %s1557_s6 }
 0x179   : > { %p1131_p0 = scmp.lt.s32.totalorder %s1129_s20, %s1125_s16 }
 0x17a   : > { %p1127_p9 = pnand %p1126_p4, %p1582_p2 }
 0x17b   : > { %p1132_p1 = por %p1131_p0, %p1130_p11 }
 0x17c   : > { %p1128_p3 = pneg %p1127_p9 }
 0x17e   : > { %p1133_p6 = pnand %p1132_p1, %p1128_p3 }
 0x180   : > { %1136 = shalt.err (!%p1133_p6)
}
 0x181   : > { %931 = dma.vmem_to_hbm [thread:$0]  (%p1582_p2), %s626_s5, 128, %s1465_s25, %s602_s24  }
 0x182   : > { %s1583_s9 = scalar_lea.vmem [#allocation13], %s1390_s10  ;;  %s1511_s19 = scalar_lea.hbm %s1559_s8, %s1451_s13 }
 0x183   : > { %s651_s26 = sshll.u32 %s1583_s9, 4  ;;  %s1584_s16 = smov %s1583_s9  ;;  %s652_s26 = int_to_ptr.vmem [resolvable:$true] %s651_s26 }
 0x184   : > { %s1137_s4 = scalar_lea.vmem %s652_s26, 128  ;;  %s1221_s11 = smov [#allocation13]  }
 0x185   : > { %p1138_p12 = scmp.ne.s32.totalorder %s652_s26, %s1137_s4  ;;  %s1141_s20 = sshll.u32 %s1221_s11, 4  ;;  %s1142_s20 = int_to_ptr.vmem [resolvable:$false] %s1141_s20 }
 0x186   : > { %s1143_s25 = scalar_lea.vmem %s1142_s20, 256  ;;  %p1144_p13 = scmp.lt.s32.totalorder %s652_s26, %s1142_s20 }
 0x187   : > { %p1139_p7 = pnand %p1138_p12, %p1582_p2  ;;  %p1145_p5 = scmp.lt.s32.totalorder %s1143_s25, %s1137_s4 }
 0x189   : > { %p1140_p10 = pneg %p1139_p7  ;;  %p1146_p8 = por %p1145_p5, %p1144_p13 }
 0x18b   : > { %p1147_p4 = pnand %p1146_p8, %p1140_p10 }
 0x21f   : > { %v592_v1 = vpop.f32.mrf.mxu1 }
 0x220   : > { %600 = vst [vmem:[%s1584_s16] sm:$0xff] %v592_v1 }
 0x221   : > { %v920_v2 = vpop.f32.mrf.mxu1 }
 0x222   : > { %1150 = shalt.err (!%p1147_p4)
}
 0x223   : > { %s1151_s10 = scalar_lea.hbm %s1511_s19, 128  ;;  %s1155_s24 = scalar_lea.hbm %s1559_s8, 1024 }
 0x224   : > { %p1152_p9 = scmp.ne.s32.totalorder %s1511_s19, %s1151_s10  ;;  %p1156_p0 = scmp.lt.s32.totalorder %s1511_s19, %s1559_s8 }
 0x225   : > { %p1157_p1 = scmp.lt.s32.totalorder %s1155_s24, %s1151_s10 }
 0x226   : > { %p1153_p3 = pnand %p1152_p9, %p1582_p2 }
 0x227   : > { %p1158_p6 = por %p1157_p1, %p1156_p0 }
 0x228   : > { %p1154_p11 = pneg %p1153_p3 }
 0x22a   : > { %p1159_p12 = pnand %p1158_p6, %p1154_p11 }
 0x22c   : > { %1162 = shalt.err (!%p1159_p12)
}
 0x22d   : > { %933 = dma.vmem_to_hbm [thread:$0]  (%p1582_p2), %s652_s26, 128, %s1511_s19, %s1467_s22  }
 0x22e PF: > { %p963_p7 = scmp.ge.s32.totalorder %s1209_s30, 2  ;;  %s663_s9 = sand.u32 1, %s1197_s27  }
 0x22f   : > { %p1585_p10 = scmp.ne.s32.totalorder %s1568_s12, 0  ;;  %s664_s18 = scalar_lea.sflag [#allocation6], %s663_s9 }
 0x231   : > { %p949_p13 = pnand %p963_p7, %p1585_p10 }
 0x233   : > { %p950_p5 = pneg %p949_p13 }
 0x235   : > { %1188 = dma.done.wait (%p950_p5), %s664_s18, 128  }
 0x236   : > { %1190 = vsyncadd (%p950_p5), %s664_s18, 4294967168  ;;  %s1586_s15 = sadd.s32 4294967294, %s1209_s30  }
 0x237   : > { %s672_s16 = sand.u32 1, %s1586_s15  }
 0x238   : > { %s673_s4 = scalar_lea.sflag [#allocation12], %s672_s16 }
 0x239   : > { %1192 = dma.done.wait (%p950_p5), %s673_s4, 256  }
 0x23a   : > { %1194 = vsyncadd (%p950_p5), %s673_s4, 4294967040  ;;  %s1587_s17 = sld [smem:[#allocation18_spill]]  ;;  %p26_p2 = scmp.ge.s32.totalorder %s1341_s14, 10  }
 0x23b   : > { %s1588_s27 = smov %s1201_s28  ;;  %s1589_s28 = smov %s1205_s29 }
 0x23c   : > { %s1591_s30 = smov %s1341_s14  ;;  %28 = sbr.rel (!%p26_p2) target bundleno = 11 (0xb), region = 136 }
 0x240   : > { %s1590_s29 = smov %s1587_s17 }
 0x241   :  { %687 = vsyncpa [#allocation5], 1 }
 0x242   :  { %689 = vsyncpa [#allocation5 + $0x1], 1 }
 0x243   :  { %690 = vsyncpa [#allocation8], 1 }
 0x244   :  { %691 = vsyncpa [#allocation6], 1 }
 0x245   :  { %693 = vsyncpa [#allocation6 + $0x1], 1 }
 0x246   :  { %694 = vsyncpa [#allocation12], 1 }
 0x247   :  { %696 = vsyncpa [#allocation12 + $0x1], 1 }

</bundles_post_ra>
